<compile_context>
chip_gen: v6e
topology: v6e:2x2x1
jax: 0.10.0
libtpu: 0.0.40
codegen_flags: <defaults>
</compile_context>

<pallas_src>
import functools
import math

import jax
import jax.numpy as jnp
import numpy as np
from jax import lax
from jax.experimental import pallas as pl
from jax.experimental.pallas import tpu as pltpu


def _distill_partial_kernel(d_ref, s_ref, t_ref,
                            sum_s_ref, sum_t_ref, cnt_ref,
                            *, mode, depth_min, depth_max, num_bins,
                            hw, tile_hw):
    """Grid: (batch n [parallel], hw tile j [arbitrary]).

    Emits per-batch partial sums:
      sum_s_ref/sum_t_ref : (1, C, num_bins)   f32
      cnt_ref             : (1, num_bins, 1)   f32
    """
    j = pl.program_id(1)

    @pl.when(j == 0)
    def _():
        sum_s_ref[...] = jnp.zeros_like(sum_s_ref)
        sum_t_ref[...] = jnp.zeros_like(sum_t_ref)
        cnt_ref[...] = jnp.zeros_like(cnt_ref)

    d = d_ref[0].astype(jnp.float32)                      # (1, TP), lane-dense
    nb_f = float(num_bins)

    # bin_depths(..., target=True), elementwise.
    if mode == 'UD':
        bin_size = (depth_max - depth_min) / num_bins
        idx_f = (d - depth_min) / bin_size
    elif mode == 'LID':
        bin_size = 2.0 * (depth_max - depth_min) / (num_bins * (1 + num_bins))
        idx_f = -0.5 + 0.5 * jnp.sqrt(1.0 + 8.0 * (d - depth_min) / bin_size)
    elif mode == 'SID':
        idx_f = num_bins * (jnp.log(1.0 + d) - math.log(1.0 + depth_min)) / (
            math.log(1.0 + depth_max) - math.log(1.0 + depth_min))
    else:
        raise NotImplementedError(mode)
    bad = (idx_f < 0.0) | (idx_f > nb_f) | (~jnp.isfinite(idx_f))
    idx = jnp.where(bad, nb_f, idx_f).astype(jnp.int32)   # (1, TP); trunc==floor (>=0)

    s = s_ref[0]                                          # (C, TP), native dtype
    t = t_ref[0]

    def _accumulate(idx_v, s_v, t_v):
        rows = lax.broadcasted_iota(jnp.int32, (num_bins, tile_hw), 0)
        onehot = (idx_v == rows)                          # (NB, TP); invalid bin -> all 0
        oh = onehot.astype(s_v.dtype)
        # (C, TP) x (NB, TP) contracting the position/lane axis -> (C, NB).
        # The big activation block is the non-transposed streamed operand.
        dn = (((1,), (1,)), ((), ()))
        sum_s_ref[0] = sum_s_ref[0] + lax.dot_general(
            s_v, oh, dn, preferred_element_type=jnp.float32)
        sum_t_ref[0] = sum_t_ref[0] + lax.dot_general(
            t_v, oh, dn, preferred_element_type=jnp.float32)
        # Counts via a cross-lane (XLU) reduce -- no N=1 matmul.
        cnt_ref[0] = cnt_ref[0] + jnp.sum(
            onehot.astype(jnp.float32), axis=1, keepdims=True)

    if hw % tile_hw != 0:
        last_j = pl.num_programs(1) - 1

        @pl.when(j != last_j)
        def _():
            _accumulate(idx, s, t)

        @pl.when(j == last_j)
        def _():
            # Ragged last tile: OOB lanes hold HBM garbage -> force them to the
            # invalid bin AND zero the activations (0 * NaN would poison sums).
            pos = j * tile_hw + lax.broadcasted_iota(jnp.int32, (1, tile_hw), 1)
            valid = pos < hw                              # (1, TP)
            idx_m = jnp.where(valid, idx, num_bins)
            zero = jnp.zeros((), s.dtype)
            _accumulate(idx_m, jnp.where(valid, s, zero), jnp.where(valid, t, zero))
    else:
        _accumulate(idx, s, t)


def custom_distill_loss(preds_S, preds_T, depth_gt, *, depth_min, depth_max,
                        mode, num_bins, tau=1.0, loss_weight=1.0, tile_hw=None):
    """preds_S/preds_T: (N, C, H, W); depth_gt: (N, 1, H, W). Returns scalar loss."""
    del tau  # unused in the reference forward (as is the KLDivLoss criterion)
    N, C, H, W = preds_S.shape
    assert preds_T.shape == (N, C, H, W)
    HW = H * W
    NB = int(num_bins)

    # Free reshapes only -- keep the native NCHW layout and dtype.
    s = preds_S.reshape(N, C, HW)
    t = preds_T.reshape(N, C, HW)
    d = depth_gt.reshape(N, 1, HW)

    itemsize = jnp.dtype(preds_S.dtype).itemsize
    d_itemsize = jnp.dtype(depth_gt.dtype).itemsize

    if tile_hw is None:
        # Large position tiles to amortize the ~0.35us per-step overhead,
        # sized from the double-buffered working set.
        per_pos = 2 * C * itemsize + d_itemsize
        tile_hw = (12 << 20) // max(per_pos, 1)
        tile_hw = int(min(max(tile_hw, 512), 4096))
    # Multiple of 128, no larger than the (128-aligned) HW extent.
    hw_floor = max(128, (HW // 128) * 128)
    tile_hw = max(128, min((tile_hw // 128) * 128, hw_floor))
    n_hw_tiles = -(-HW // tile_hw)

    kernel = functools.partial(
        _distill_partial_kernel, mode=mode, depth_min=float(depth_min),
        depth_max=float(depth_max), num_bins=NB, hw=HW, tile_hw=tile_hw)

    # VMEM budget from the actual double-buffered footprint; <= 48 MiB so v7x
    # (64 MiB physical) keeps headroom for compiler-internal scratch.
    block_in_bytes = tile_hw * (2 * C * itemsize + d_itemsize)
    out_block_bytes = (2 * C * NB + NB) * 4
    vmem_limit = 2 * block_in_bytes + 2 * out_block_bytes + (6 << 20)
    vmem_limit = int(min(max(vmem_limit, 16 << 20), 48 << 20))

    P = N * HW
    cost = pl.CostEstimate(
        flops=int(4 * P * NB * C),
        transcendentals=int(P if mode in ('LID', 'SID') else 0),
        bytes_accessed=int(2 * P * C * itemsize + P * d_itemsize
                           + N * (2 * C * NB + NB) * 4))

    sum_s, sum_t, cnt = pl.pallas_call(
        kernel,
        out_shape=(
            jax.ShapeDtypeStruct((N, C, NB), jnp.float32),
            jax.ShapeDtypeStruct((N, C, NB), jnp.float32),
            jax.ShapeDtypeStruct((N, NB, 1), jnp.float32),
        ),
        grid_spec=pltpu.PrefetchScalarGridSpec(
            num_scalar_prefetch=0,
            grid=(N, n_hw_tiles),
            in_specs=[
                pl.BlockSpec((1, 1, tile_hw), lambda n, j: (n, 0, j)),  # depth
                pl.BlockSpec((1, C, tile_hw), lambda n, j: (n, 0, j)),  # student
                pl.BlockSpec((1, C, tile_hw), lambda n, j: (n, 0, j)),  # teacher
            ],
            out_specs=[
                pl.BlockSpec((1, C, NB), lambda n, j: (n, 0, 0)),
                pl.BlockSpec((1, C, NB), lambda n, j: (n, 0, 0)),
                pl.BlockSpec((1, NB, 1), lambda n, j: (n, 0, 0)),
            ]),
        compiler_params=pltpu.CompilerParams(
            dimension_semantics=("parallel", "arbitrary"),
            vmem_limit_bytes=vmem_limit),
        cost_estimate=cost,
    )(d, s, t)

    # --- tiny plain-JAX epilogue: O(num_bins * C), negligible ---------------
    sum_s = jnp.sum(sum_s, axis=0)            # (C, NB)
    sum_t = jnp.sum(sum_t, axis=0)
    cnt = jnp.sum(cnt, axis=0)[:, 0]          # (NB,)

    valid = cnt > 0.0
    safe = jnp.where(valid, cnt, 1.0)
    mean_s = sum_s / safe[None, :]            # adaptive_avg_pool1d(.,1) == mean
    mean_t = sum_t / safe[None, :]

    def _l2(m):                               # F.normalize(p=2, dim=0), eps=1e-12
        nrm = jnp.sqrt(jnp.sum(m * m, axis=0, keepdims=True))
        return m / jnp.maximum(nrm, 1e-12)

    # Empty bins are skipped in the torch loop; zero columns in both Gram
    # matrices add nothing to the squared-diff sum, and the mean divides by
    # (#valid bins)^2 -- semantics match exactly.
    fs = jnp.where(valid[None, :], _l2(mean_s), 0.0)   # (C, NB)
    ft = jnp.where(valid[None, :], _l2(mean_t), 0.0)
    gram_s = fs.T @ fs                                  # (NB, NB)
    gram_t = ft.T @ ft
    diff = gram_s - gram_t
    k = jnp.maximum(jnp.sum(valid.astype(jnp.float32)), 1.0)
    return loss_weight * jnp.sum(diff * diff) / (k * k)


def _reference(preds_S, preds_T, depth_gt, *, depth_min, depth_max, mode,
               num_bins, loss_weight):
    """Pure numpy re-implementation of the PyTorch forward (float64)."""
    S = np.asarray(preds_S, np.float64)
    T = np.asarray(preds_T, np.float64)
    N, C, H, W = S.shape
    d = np.asarray(depth_gt, np.float64).reshape(N, H, W)
    if mode == 'UD':
        idx = (d - depth_min) / ((depth_max - depth_min) / num_bins)
    elif mode == 'LID':
        bs = 2 * (depth_max - depth_min) / (num_bins * (1 + num_bins))
        idx = -0.5 + 0.5 * np.sqrt(1 + 8 * (d - depth_min) / bs)
    elif mode == 'SID':
        idx = num_bins * (np.log(1 + d) - math.log(1 + depth_min)) / (
            math.log(1 + depth_max) - math.log(1 + depth_min))
    else:
        raise NotImplementedError(mode)
    bad = (idx < 0) | (idx > num_bins) | ~np.isfinite(idx)
    idx = np.where(bad, num_bins, idx).astype(np.int64)
    protos_S, protos_T = [], []
    for j in range(num_bins):
        m = idx == j
        if not m.any():
            continue
        fS = S.transpose(1, 0, 2, 3)[:, m]
        fT = T.transpose(1, 0, 2, 3)[:, m]
        aS, aT = fS.mean(axis=1), fT.mean(axis=1)
        protos_S.append(aS / max(np.linalg.norm(aS), 1e-12))
        protos_T.append(aT / max(np.linalg.norm(aT), 1e-12))
    Sf = np.stack(protos_S, axis=1)
    Tf = np.stack(protos_T, axis=1)
    simS, simT = Sf.T @ Sf, Tf.T @ Tf
    return loss_weight * ((simS - simT) ** 2).mean()


def _check(key, N, C, H, W, *, depth_min, depth_max, num_bins, mode, loss_weight):
    k1, k2, k3 = jax.random.split(key, 3)
    preds_S = jax.random.normal(k1, (N, C, H, W), dtype=jnp.float32)
    preds_T = jax.random.normal(k2, (N, C, H, W), dtype=jnp.float32)
    # include some out-of-range depths to exercise the invalid-bin masking
    depth_gt = jax.random.uniform(k3, (N, 1, H, W), dtype=jnp.float32,
                                  minval=depth_min - 2.0, maxval=depth_max + 2.0)
    loss = custom_distill_loss(preds_S, preds_T, depth_gt,
                               depth_min=depth_min, depth_max=depth_max,
                               mode=mode, num_bins=num_bins,
                               tau=1.0, loss_weight=loss_weight)
    loss = jax.block_until_ready(loss)
    ref = _reference(preds_S, preds_T, depth_gt,
                     depth_min=depth_min, depth_max=depth_max,
                     mode=mode, num_bins=num_bins, loss_weight=loss_weight)
    assert abs(float(loss) - float(ref)) <= 1e-4 * max(1.0, abs(float(ref))), \
        (float(loss), float(ref))


if __name__ == "__main__":
    key = jax.random.PRNGKey(0)
    ka, kb = jax.random.split(key, 2)

    # Case A: LID mode, HW a multiple of 128 (full tiles only -> unmasked path).
    _check(ka, 2, 4, 16, 16,
           depth_min=2.0, depth_max=46.8, num_bins=8, mode='LID', loss_weight=1.0)

    # Case B: UD mode, ragged HW (140 positions -> exercises last-tile masking).
    _check(kb, 2, 4, 10, 14,
           depth_min=2.0, depth_max=46.8, num_bins=8, mode='UD', loss_weight=0.5)

    print("KERNEL_OK")
</pallas_src>

<mosaic_0001>
module attributes {stable_mosaic.version = 11 : i64} {
  func.func @_distill_partial_kernel(%arg0: i32, %arg1: i32, %arg2: memref<1x1x256xf32, #tpu.memory_space<vmem>>, %arg3: memref<1x4x256xf32, #tpu.memory_space<vmem>>, %arg4: memref<1x4x256xf32, #tpu.memory_space<vmem>>, %arg5: memref<1x4x8xf32, #tpu.memory_space<vmem>>, %arg6: memref<1x4x8xf32, #tpu.memory_space<vmem>>, %arg7: memref<1x8x1xf32, #tpu.memory_space<vmem>>) attributes {dimension_semantics = [#tpu.dimension_semantics<parallel>, #tpu.dimension_semantics<arbitrary>], iteration_bounds = array<i64: 2, 1>, scalar_prefetch = 0 : i64, scratch_operands = 0 : i64, tpu.core_type = #tpu.core_type<tc>, window_params = [{transform_indices = @transform_0, window_bounds = array<i64: 1, 1, 256>}, {transform_indices = @transform_1, window_bounds = array<i64: 1, 4, 256>}, {transform_indices = @transform_2, window_bounds = array<i64: 1, 4, 256>}, {transform_indices = @transform_3, window_bounds = array<i64: 1, 4, 8>}, {transform_indices = @transform_4, window_bounds = array<i64: 1, 4, 8>}, {transform_indices = @transform_5, window_bounds = array<i64: 1, 8, 1>}]} {
    %c0_i32 = arith.constant 0 : i32
    %0 = arith.cmpi eq, %arg1, %c0_i32 : i32
    %1 = arith.extui %0 : i1 to i32
    %c0_i32_0 = arith.constant 0 : i32
    %2 = arith.cmpi ne, %1, %c0_i32_0 : i32
    scf.if %2 {
      %cst_40 = arith.constant 0.000000e+00 : f32
      %63 = vector.broadcast %cst_40 : f32 to vector<1x4x8xf32>
      %c0_41 = arith.constant 0 : index
      %c0_42 = arith.constant 0 : index
      %c0_43 = arith.constant 0 : index
      %64 = vector.load %arg5[%c0_41, %c0_42, %c0_43] : memref<1x4x8xf32, #tpu.memory_space<vmem>>, vector<1x4x8xf32>
      tpu.vector_store %arg5[%c0_41, %c0_42, %c0_43], %63 {strides = array<i32>} : memref<1x4x8xf32, #tpu.memory_space<vmem>>, vector<1x4x8xf32>,
      %cst_44 = arith.constant 0.000000e+00 : f32
      %65 = vector.broadcast %cst_44 : f32 to vector<1x4x8xf32>
      %c0_45 = arith.constant 0 : index
      %c0_46 = arith.constant 0 : index
      %c0_47 = arith.constant 0 : index
      %66 = vector.load %arg6[%c0_45, %c0_46, %c0_47] : memref<1x4x8xf32, #tpu.memory_space<vmem>>, vector<1x4x8xf32>
      tpu.vector_store %arg6[%c0_45, %c0_46, %c0_47], %65 {strides = array<i32>} : memref<1x4x8xf32, #tpu.memory_space<vmem>>, vector<1x4x8xf32>,
      %cst_48 = arith.constant 0.000000e+00 : f32
      %67 = vector.broadcast %cst_48 : f32 to vector<1x8x1xf32>
      %c0_49 = arith.constant 0 : index
      %c0_50 = arith.constant 0 : index
      %c0_51 = arith.constant 0 : index
      %68 = vector.load %arg7[%c0_49, %c0_50, %c0_51] : memref<1x8x1xf32, #tpu.memory_space<vmem>>, vector<1x8x1xf32>
      tpu.vector_store %arg7[%c0_49, %c0_50, %c0_51], %67 {strides = array<i32>} : memref<1x8x1xf32, #tpu.memory_space<vmem>>, vector<1x8x1xf32>,
    } else {
    }
    %c0 = arith.constant 0 : index
    %c0_1 = arith.constant 0 : index
    %c0_2 = arith.constant 0 : index
    %3 = vector.load %arg2[%c0, %c0_1, %c0_2] : memref<1x1x256xf32, #tpu.memory_space<vmem>>, vector<1x1x256xf32>
    %4 = vector.shape_cast %3 : vector<1x1x256xf32> to vector<1x256xf32>
    %cst = arith.constant 2.000000e+00 : f32
    %5 = vector.broadcast %cst : f32 to vector<1x256xf32>
    %6 = arith.subf %4, %5 : vector<1x256xf32>
    %cst_3 = arith.constant 8.000000e+00 : f32
    %7 = vector.broadcast %cst_3 : f32 to vector<1x256xf32>
    %8 = arith.mulf %7, %6 : vector<1x256xf32>
    %cst_4 = arith.constant 1.24444449 : f32
    %9 = vector.broadcast %cst_4 : f32 to vector<1x256xf32>
    %10 = arith.divf %8, %9 : vector<1x256xf32>
    %cst_5 = arith.constant 1.000000e+00 : f32
    %11 = vector.broadcast %cst_5 : f32 to vector<1x256xf32>
    %12 = arith.addf %11, %10 : vector<1x256xf32>
    %13 = math.sqrt %12 : vector<1x256xf32>
    %cst_6 = arith.constant 5.000000e-01 : f32
    %14 = vector.broadcast %cst_6 : f32 to vector<1x256xf32>
    %15 = arith.mulf %14, %13 : vector<1x256xf32>
    %cst_7 = arith.constant -5.000000e-01 : f32
    %16 = vector.broadcast %cst_7 : f32 to vector<1x256xf32>
    %17 = arith.addf %16, %15 : vector<1x256xf32>
    %cst_8 = arith.constant 0.000000e+00 : f32
    %18 = vector.broadcast %cst_8 : f32 to vector<1x256xf32>
    %19 = arith.cmpf olt, %17, %18 : vector<1x256xf32>
    %cst_9 = arith.constant 8.000000e+00 : f32
    %20 = vector.broadcast %cst_9 : f32 to vector<1x256xf32>
    %21 = arith.cmpf ogt, %17, %20 : vector<1x256xf32>
    %22 = arith.ori %19, %21 : vector<1x256xi1>
    %23 = tpu.weird %17 : vector<1x256xf32> -> vector<1x256xi1>
    %cst_10 = arith.constant dense<true> : vector<1x256xi1>
    %24 = arith.xori %23, %cst_10 : vector<1x256xi1>
    %cst_11 = arith.constant dense<true> : vector<1x256xi1>
    %25 = arith.xori %24, %cst_11 : vector<1x256xi1>
    %26 = arith.ori %22, %25 : vector<1x256xi1>
    %cst_12 = arith.constant 8.000000e+00 : f32
    %27 = vector.broadcast %cst_12 : f32 to vector<1x256xf32>
    %28 = arith.select %26, %27, %17 : vector<1x256xi1>, vector<1x256xf32>
    %29 = arith.fptosi %28 : vector<1x256xf32> to vector<1x256xi32>
    %c0_13 = arith.constant 0 : index
    %c0_14 = arith.constant 0 : index
    %c0_15 = arith.constant 0 : index
    %30 = vector.load %arg3[%c0_13, %c0_14, %c0_15] : memref<1x4x256xf32, #tpu.memory_space<vmem>>, vector<1x4x256xf32>
    %31 = vector.shape_cast %30 : vector<1x4x256xf32> to vector<4x256xf32>
    %c0_16 = arith.constant 0 : index
    %c0_17 = arith.constant 0 : index
    %c0_18 = arith.constant 0 : index
    %32 = vector.load %arg4[%c0_16, %c0_17, %c0_18] : memref<1x4x256xf32, #tpu.memory_space<vmem>>, vector<1x4x256xf32>
    %33 = vector.shape_cast %32 : vector<1x4x256xf32> to vector<4x256xf32>
    %34 = tpu.iota {dimensions = array<i32: 0>} : vector<8x256xi32>
    %35 = vector.broadcast %29 : vector<1x256xi32> to vector<8x256xi32>
    %36 = arith.cmpi eq, %35, %34 : vector<8x256xi32>
    %37 = arith.extui %36 : vector<8x256xi1> to vector<8x256xi32>
    %38 = arith.sitofp %37 : vector<8x256xi32> to vector<8x256xf32>
    %c0_19 = arith.constant 0 : index
    %c0_20 = arith.constant 0 : index
    %c0_21 = arith.constant 0 : index
    %39 = vector.load %arg5[%c0_19, %c0_20, %c0_21] : memref<1x4x8xf32, #tpu.memory_space<vmem>>, vector<1x4x8xf32>
    %40 = vector.shape_cast %39 : vector<1x4x8xf32> to vector<4x8xf32>
    %cst_22 = arith.constant dense<0.000000e+00> : vector<4x8xf32>
    %41 = tpu.matmul %31, %38, %cst_22 {dimension_numbers = #tpu.dot_dimension_numbers<[1], [1], [0], [0], [0, 0, 1, 0], [], []>} : vector<4x256xf32>, vector<8x256xf32>, vector<4x8xf32> -> vector<4x8xf32>
    %42 = arith.addf %40, %41 : vector<4x8xf32>
    %c0_23 = arith.constant 0 : index
    %c0_24 = arith.constant 0 : index
    %c0_25 = arith.constant 0 : index
    %43 = vector.load %arg5[%c0_23, %c0_24, %c0_25] : memref<1x4x8xf32, #tpu.memory_space<vmem>>, vector<1x4x8xf32>
    %44 = vector.shape_cast %43 : vector<1x4x8xf32> to vector<4x8xf32>
    %45 = vector.shape_cast %42 : vector<4x8xf32> to vector<1x4x8xf32>
    tpu.vector_store %arg5[%c0_23, %c0_24, %c0_25], %45 {strides = array<i32>} : memref<1x4x8xf32, #tpu.memory_space<vmem>>, vector<1x4x8xf32>,
    %c0_26 = arith.constant 0 : index
    %c0_27 = arith.constant 0 : index
    %c0_28 = arith.constant 0 : index
    %46 = vector.load %arg6[%c0_26, %c0_27, %c0_28] : memref<1x4x8xf32, #tpu.memory_space<vmem>>, vector<1x4x8xf32>
    %47 = vector.shape_cast %46 : vector<1x4x8xf32> to vector<4x8xf32>
    %cst_29 = arith.constant dense<0.000000e+00> : vector<4x8xf32>
    %48 = tpu.matmul %33, %38, %cst_29 {dimension_numbers = #tpu.dot_dimension_numbers<[1], [1], [0], [0], [0, 0, 1, 0], [], []>} : vector<4x256xf32>, vector<8x256xf32>, vector<4x8xf32> -> vector<4x8xf32>
    %49 = arith.addf %47, %48 : vector<4x8xf32>
    %c0_30 = arith.constant 0 : index
    %c0_31 = arith.constant 0 : index
    %c0_32 = arith.constant 0 : index
    %50 = vector.load %arg6[%c0_30, %c0_31, %c0_32] : memref<1x4x8xf32, #tpu.memory_space<vmem>>, vector<1x4x8xf32>
    %51 = vector.shape_cast %50 : vector<1x4x8xf32> to vector<4x8xf32>
    %52 = vector.shape_cast %49 : vector<4x8xf32> to vector<1x4x8xf32>
    tpu.vector_store %arg6[%c0_30, %c0_31, %c0_32], %52 {strides = array<i32>} : memref<1x4x8xf32, #tpu.memory_space<vmem>>, vector<1x4x8xf32>,
    %c0_33 = arith.constant 0 : index
    %c0_34 = arith.constant 0 : index
    %c0_35 = arith.constant 0 : index
    %53 = vector.load %arg7[%c0_33, %c0_34, %c0_35] : memref<1x8x1xf32, #tpu.memory_space<vmem>>, vector<1x8x1xf32>
    %54 = vector.shape_cast %53 : vector<1x8x1xf32> to vector<8x1xf32>
    %55 = arith.extui %36 : vector<8x256xi1> to vector<8x256xi32>
    %56 = arith.sitofp %55 : vector<8x256xi32> to vector<8x256xf32>
    %cst_36 = arith.constant dense<0.000000e+00> : vector<8xf32>
    %57 = vector.multi_reduction <add>, %56, %cst_36 [1] : vector<8x256xf32> to vector<8xf32>
    %58 = vector.shape_cast %57 : vector<8xf32> to vector<8x1xf32>
    %59 = arith.addf %54, %58 : vector<8x1xf32>
    %c0_37 = arith.constant 0 : index
    %c0_38 = arith.constant 0 : index
    %c0_39 = arith.constant 0 : index
    %60 = vector.load %arg7[%c0_37, %c0_38, %c0_39] : memref<1x8x1xf32, #tpu.memory_space<vmem>>, vector<1x8x1xf32>
    %61 = vector.shape_cast %60 : vector<1x8x1xf32> to vector<8x1xf32>
    %62 = vector.shape_cast %59 : vector<8x1xf32> to vector<1x8x1xf32>
    tpu.vector_store %arg7[%c0_37, %c0_38, %c0_39], %62 {strides = array<i32>} : memref<1x8x1xf32, #tpu.memory_space<vmem>>, vector<1x8x1xf32>,
    return
  }
  func.func @transform_0(%arg0: i32, %arg1: i32) -> (i32, i32, i32) {
    %c0_i32 = arith.constant 0 : i32
    %c0_i32_0 = arith.constant 0 : i32
    return %arg0, %c0_i32, %arg1 : i32, i32, i32
  }
  func.func @transform_1(%arg0: i32, %arg1: i32) -> (i32, i32, i32) {
    %c0_i32 = arith.constant 0 : i32
    %c0_i32_0 = arith.constant 0 : i32
    return %arg0, %c0_i32, %arg1 : i32, i32, i32
  }
  func.func @transform_2(%arg0: i32, %arg1: i32) -> (i32, i32, i32) {
    %c0_i32 = arith.constant 0 : i32
    %c0_i32_0 = arith.constant 0 : i32
    return %arg0, %c0_i32, %arg1 : i32, i32, i32
  }
  func.func @transform_3(%arg0: i32, %arg1: i32) -> (i32, i32, i32) {
    %c0_i32 = arith.constant 0 : i32
    %c0_i32_0 = arith.constant 0 : i32
    %c0_i32_1 = arith.constant 0 : i32
    return %arg0, %c0_i32, %c0_i32_0 : i32, i32, i32
  }
  func.func @transform_4(%arg0: i32, %arg1: i32) -> (i32, i32, i32) {
    %c0_i32 = arith.constant 0 : i32
    %c0_i32_0 = arith.constant 0 : i32
    %c0_i32_1 = arith.constant 0 : i32
    return %arg0, %c0_i32, %c0_i32_0 : i32, i32, i32
  }
  func.func @transform_5(%arg0: i32, %arg1: i32) -> (i32, i32, i32) {
    %c0_i32 = arith.constant 0 : i32
    %c0_i32_0 = arith.constant 0 : i32
    %c0_i32_1 = arith.constant 0 : i32
    return %arg0, %c0_i32, %c0_i32_0 : i32, i32, i32
  }
}

</mosaic_0001>

<bundles_post_ra>
// kernel: tpu_custom_call.1
= control target key start
LH: loop header
LB: loop body
LE: loop exit
PB: predicated region body
PF: predicated region fallthrough
CT: control target
= control target key end

     0   :  { %s1403_s0 = inlined_call_operand.hbm [shape: f32[2,1,256], index: 0, kind: input, shape index: {}]   ;;  %s1404_s1 = inlined_call_operand.hbm [shape: f32[2,4,256], index: 1, kind: input, shape index: {}]   ;;  %s1405_s2 = inlined_call_operand.hbm [shape: f32[2,4,256], index: 2, kind: input, shape index: {}]   ;;  %s1406_s3 = inlined_call_operand.hbm [shape: f32[2,4,8], index: 3, kind: output, shape index: {0}]   ;;  %s1407_s4 = inlined_call_operand.hbm [shape: f32[2,4,8], index: 4, kind: output, shape index: {1}]   ;;  %s1408_s5 = inlined_call_operand.vmem [shape: f32[2,8,1], index: 5, kind: output, shape index: {2}]  }
   0x1   :  { %1412 = sst [smem:[#allocation19_spill]] %s1404_s1 }
   0x2   :  { %1413 = sst [smem:[#allocation20_spill]] %s1405_s2 }
   0x3   :  { %11 = vsyncpa [#allocation3], 0 }
   0x4   :  { %13 = vsyncpa [#allocation3 + $0x1], 0 }
   0x5   :  { %14 = vsyncpa [#allocation6], 0 }
   0x6   :  { %16 = vsyncpa [#allocation6 + $0x1], 0 }
   0x7   :  { %17 = vsyncpa [#allocation4], 0 }
   0x8   :  { %19 = vsyncpa [#allocation4 + $0x1], 0 }
   0x9   :  { %20 = vsyncpa [#allocation10], 0 }
   0xa   :  { %22 = vsyncpa [#allocation10 + $0x1], 0  ;;  %s1154_s18 = smov 0   ;;  %s1156_s19 = smov 0  }
   0xb   :  { %s1158_s20 = smov 0   ;;  %s1160_s21 = smov 0  }
   0xc   :  { %s1162_s22 = smov 0   ;;  %s1164_s23 = smov 0  }
   0xd LB: > { %1414 = sst [smem:[#allocation15_spill]] %s1103_s20  ;;  %s1185_s24 = sadd.s32 4294967295, %s1115_s23   ;;  %s1115_s23 = sphi %s1164_s23, %s28_s23   ;;  %s1111_s22 = sphi %s1162_s22, %s1430_s22   ;;  %s1107_s21 = sphi %s1160_s21, %s1429_s21   ;;  %s1103_s20 = sphi %s1158_s20, %s1428_s20   ;;  %s1099_s19 = sphi %s1156_s19, %s1432_s19   ;;  %s1095_s18 = sphi %s1154_s18, %s1431_s18  }
   0xe   : > { %1415 = sst [smem:[#allocation16_spill]] %s1111_s22  ;;  %s797_s25 = sadd.s32 4294967294, %s1115_s23  }
   0xf   : > { %s40_s26 = sadd.s32 1, %s1111_s22  ;;  %s49_s27 = sadd.s32 1, %s1103_s20 }
  0x10   : > { %p42_p0 = scmp.ge.s32.totalorder %s40_s26, 2  ;;  %p56_p1 = scmp.ne.s32.totalorder %s1103_s20, %s1099_s19 }
  0x11   : > { %p57_p2 = scmp.eq.s32.totalorder %s1115_s23, 0  ;;  %p62_p3 = scmp.ne.s32.totalorder %s1099_s19, %s1095_s18 }
  0x12   : > { %s1434_s26 = smov (%p42_p0, %s40_s26), 0  ;;  %p63_p5 = scmp.eq.s32.totalorder %s1185_s24, 0 }
  0x13   : > { %1416 = sst [smem:[#allocation17_spill]] %s1434_s26  ;;  %p1197_p4 = por %p57_p2, %p56_p1 }
  0x14   : > { %s44_s29 = ssub.s32 %s1111_s22, %s1434_s26  ;;  %p142_p6 = scmp.eq.s32.totalorder %s1185_s24, 1 }
  0x15   : > { %p47_p7 = scmp.eq.s32.totalorder %s44_s29, 0  ;;  %p1205_p8 = por %p63_p5, %p62_p3 }
  0x16   : > { %p1209_p9 = por %p142_p6, %p56_p1  ;;  %p148_p10 = scmp.eq.s32.totalorder %s797_s25, 1 }
  0x17   : > { %s1214_s7 = scalar_select %p47_p7, %s1103_s20, %s49_s27  }
  0x18   : > { %p1216_p11 = por %p148_p10, %p62_p3  ;;  %p861_p13 = scmp.lt.s32.totalorder %s1115_s23, 2 }
  0x19   : > { %1420 = sst [smem:[#allocation18_spill]] %s1214_s7  ;;  %s1223_s9 = sand.u32 1, %s1103_s20  }
  0x1a   : > { %s241_s10 = sand.u32 1, %s1115_s23   ;;  %s803_s11 = sshll.u32 %s1223_s9, 3 }
  0x1b   : > { %p1229_p0 = pnand %p861_p13, %p1197_p4  ;;  %s830_s13 = sshll.u32 %s1111_s22, 7 }
  0x1c   : > { %s1423_s1 = sld [smem:[#allocation19_spill]]  ;;  %s245_s17 = scalar_lea.vmem [#allocation5], %s803_s11 }
  0x1d   : > { %s255_s25 = sshll.u32 %s245_s17, 4  ;;  %s1424_s2 = sld [smem:[#allocation20_spill]]  ;;  %s256_s25 = int_to_ptr.vmem [resolvable:$true] %s255_s25 }
  0x1e   : > { %s1244_s28 = scalar_lea.sflag [#allocation6], %s241_s10  ;;  %p919_p1 = pneg %p1229_p0 }
  0x1f   : > { %s930_s7 = scalar_lea.vmem %s256_s25, 128  ;;  %s1117_s14 = smov [#allocation5]  }
  0x20   : > { %p931_p2 = scmp.ne.s32.totalorder %s256_s25, %s930_s7  ;;  %s935_s15 = sshll.u32 %s1117_s14, 4  ;;  %s936_s15 = int_to_ptr.vmem [resolvable:$false] %s935_s15 }
  0x21   : > { %s937_s17 = scalar_lea.vmem %s936_s15, 256  ;;  %p938_p5 = scmp.lt.s32.totalorder %s256_s25, %s936_s15 }
  0x22   : > { %s253_s16 = scalar_lea.hbm %s1423_s1, %s830_s13  ;;  %p933_p3 = pnand %p931_p2, %p919_p1 }
  0x23   : > { %s1242_s26 = scalar_lea.hbm %s1424_s2, %s830_s13  ;;  %p939_p6 = scmp.lt.s32.totalorder %s937_s17, %s930_s7 }
  0x24   : > { %p934_p4 = pneg %p933_p3 }
  0x25   : > { %p940_p7 = por %p939_p6, %p938_p5 }
  0x27   : > { %p941_p10 = pnand %p940_p7, %p934_p4 }
  0x29   : > { %944 = shalt.err (!%p941_p10)
}
  0x2a   : > { %850 = dma.hbm_to_vmem [thread:$0]  (!%p1229_p0), %s253_s16, 128, %s256_s25, %s1244_s28  }
  0x2b   : > { %p809_p13 = scmp.ge.s32.totalorder %s1115_s23, 1  ;;  %p281_p2 = scmp.lt.s32.totalorder %s1115_s23, 3 }
  0x2c   : > { %s800_s7 = sshll.u32 %s1223_s9, 1  ;;  %s829_s13 = sshll.u32 %s1111_s22, 5 }
  0x2d   : > { %p1256_p3 = pnand %p809_p13, %p281_p2  ;;  %s232_s14 = scalar_lea.hbm %s1403_s0, %s829_s13 }
  0x2e   : > { %s224_s15 = scalar_lea.vmem [#allocation2], %s800_s7  ;;  %s266_s1 = scalar_lea.vmem [#allocation7], %s803_s11 }
  0x2f   : > { %s234_s17 = sshll.u32 %s224_s15, 4  ;;  %s276_s2 = sshll.u32 %s266_s1, 4  ;;  %s235_s17 = int_to_ptr.vmem [resolvable:$true] %s234_s17  ;;  %s1267_s2 = int_to_ptr.vmem [resolvable:$true] %s276_s2 }
  0x30   : > { %s221_s16 = scalar_lea.sflag [#allocation3], %s1223_s9  ;;  %s958_s25 = scalar_lea.vmem %s235_s17, 32 }
  0x31   : > { %p959_p4 = scmp.ne.s32.totalorder %s235_s17, %s958_s25  ;;  %s1118_s22 = smov [#allocation2]  }
  0x32   : > { %s963_s20 = sshll.u32 %s1118_s22, 4  ;;  %s964_s20 = int_to_ptr.vmem [resolvable:$false] %s963_s20 }
  0x33   : > { %p961_p5 = pnand %p959_p4, %p919_p1  ;;  %s965_s27 = scalar_lea.vmem %s964_s20, 64 }
  0x34   : > { %p966_p7 = scmp.lt.s32.totalorder %s235_s17, %s964_s20  ;;  %p967_p10 = scmp.lt.s32.totalorder %s965_s27, %s958_s25 }
  0x35   : > { %p962_p6 = pneg %p961_p5 }
  0x36   : > { %p968_p13 = por %p967_p10, %p966_p7 }
  0x38   : > { %p969_p2 = pnand %p968_p13, %p962_p6 }
  0x3a   : > { %972 = shalt.err (!%p969_p2)
}
  0x3b   : > { %847 = dma.hbm_to_vmem [thread:$0]  (!%p1229_p0), %s232_s14, 32, %s235_s17, %s221_s16  }
  0x3c   : > { %s986_s1 = scalar_lea.vmem %s1267_s2, 128  ;;  %s1119_s22 = smov [#allocation7]  }
  0x3d   : > { %p987_p12 = scmp.ne.s32.totalorder %s1267_s2, %s986_s1  ;;  %s991_s9 = sshll.u32 %s1119_s22, 4  ;;  %s992_s9 = int_to_ptr.vmem [resolvable:$false] %s991_s9 }
  0x3e   : > { %s993_s20 = scalar_lea.vmem %s992_s9, 256  ;;  %p994_p7 = scmp.lt.s32.totalorder %s1267_s2, %s992_s9 }
  0x3f   : > { %p989_p4 = pnand %p987_p12, %p919_p1  ;;  %p995_p6 = scmp.lt.s32.totalorder %s993_s20, %s986_s1 }
  0x41   : > { %p990_p5 = pneg %p989_p4  ;;  %p996_p10 = por %p995_p6, %p994_p7 }
  0x43   : > { %p997_p13 = pnand %p996_p10, %p990_p5 }
  0x45   : > { %1000 = shalt.err (!%p997_p13)
}
  0x46   : > { %853 = dma.hbm_to_vmem [thread:$0]  (!%p1229_p0), %s1242_s26, 128, %s1267_s2, %s1244_s28  }
  0x47   : > { %285 = sbr.rel (%p1256_p3) target bundleno = 356 (0x164), region = 32  ;;  %s1289_s11 = sand.u32 (!%p1256_p3), 1, %s1099_s19  }
  0x48   : > { %s810_s7 = sshll.u32 (!%p1256_p3), %s1289_s11, 1  ;;  %s288_s13 = scalar_lea.sflag (!%p1256_p3), [#allocation3], %s1289_s11 }
  0x49   : > { %s291_s29 = scalar_lea.vmem (!%p1256_p3), [#allocation2], %s810_s7 }
  0x4c   : > { %1078 = dma.done.wait (%p1205_p8), %s288_s13, 32  }
  0x4d   : > { %1080 = vsyncadd (%p1205_p8), %s288_s13, 4294967264  ;;  %s296_s2 = sand.u32 1, %s1185_s24   ;;  %s811_s26 = sshll.u32 %s1289_s11, 3 }
  0x4e   : > { %s297_s12 = scalar_lea.sflag [#allocation6], %s296_s2  ;;  %s300_s28 = scalar_lea.vmem [#allocation5], %s811_s26 }
  0x4f   : > { %1082 = dma.done.wait (%p1205_p8), %s297_s12, 256  }
  0x50   : > { %1084 = vsyncadd (%p1205_p8), %s297_s12, 4294967040  ;;  %s813_s10 = sshll.u32 %s1289_s11, 2  ;;  %vm366_vm0 = vcmask 60416   ;;  %v1120_v0 = vmov 0.0   ;;  %v371_v1 = vld [vmem:[%s291_s29] sm:$0x3]  ;;  %v395_v16 = vlaneseq }
  0x51   : > { %s1306_s14 = scalar_lea.vmem [#allocation8], %s813_s10  ;;  %v393_v2 = vld [vmem:[%s300_s28] sm:$0xff]  ;;  %s309_s24 = scalar_lea.vmem [#allocation7], %s811_s26  ;;  %v816_v4 = vadd.f32 -2.0, %v371_v1  ;;  %v1121_v26 = vmov 1.0   ;;  %vm369_vm10 = vcmask 7168  }
  0x52   : > { %367 = vst.msk [vmem:[%s1306_s14] sm:$0xf] %vm366_vm0, %v1120_v0  ;;  %v394_v3 = vld [vmem:[%s309_s24] sm:$0xff]  ;;  %v413_v5 = vcombine.high %v393_v2, %v393_v2  ;;  %v396_v18 = vshrl.u32 %v395_v16, 7  ;;  %p358_p8 = scmp.lt.s32.totalorder %s1107_s21, 1  ;;  %s348_s17 = scalar_lea.vmem [#allocation9], %s813_s10 }
  0x53   : > { %v490_v6 = vcombine.high %v394_v3, %v394_v3  ;;  %v373_v7 = vmul.f32 8.0, %v816_v4  ;;  %368 = vst.msk [vmem:[%s348_s17] sm:$0xf] %vm366_vm0, %v1120_v0  ;;  %s825_s1 = sshll.u32 %s1107_s21, 6  ;;  %s594_s22 = sshll.u32 %s1306_s14, 4  ;;  %s1326_s22 = int_to_ptr.vmem [resolvable:$true] %s594_s22 }
  0x54   : > { %479 = vmatprep.mubr.f32.mxu0 %v413_v5  ;;  %v403_v21 = vsub.s32 1, %v396_v18  ;;  %v399_v22 = vsub.s32 0, %v396_v18  ;;  %s359_s30 = scalar_select %p358_p8, %s1107_s21, 1 }
  0x55   : > { %556 = vmatprep.mubr.f32.mxu1 %v490_v6  ;;  %v375_v8 = vmul.f32 0.8035714, %v373_v7  ;;  %s607_s9 = sshll.u32 %s348_s17, 4  ;;  %s1324_s13 = scalar_lea.hbm %s1406_s3, %s825_s1  ;;  %s1333_s9 = int_to_ptr.vmem [resolvable:$true] %s607_s9 }
  0x56   : > { %s815_s15 = sshll.u32 %s359_s30, 3  ;;  %s1331_s2 = scalar_lea.hbm %s1407_s4, %s825_s1 }
  0x57   : > { %v376_v9 = vadd.f32 1.0, %v375_v8  ;;  %s361_s27 = scalar_lea.vmem %s1408_s5, %s815_s15  ;;  %s572_s26 = scalar_lea.sflag [#allocation4], %s1289_s11 }
  0x58   : > { %370 = vst.msk [vmem:[%s361_s27] sm:$0xff] %vm369_vm10, %v1120_v0  ;;  %s1001_s12 = scalar_lea.vmem %s1326_s22, 64  ;;  %s1122_s28 = smov [#allocation8]  }
  0x59   : > { %915 = vrsqrt.f32 %v376_v9  ;;  %vm379_vm1 = vcmp.eq.f32.partialorder %v376_v9, inf  ;;  %v382_v11 = vand.u32 2147483648, %v376_v9  ;;  %vm381_vm2 = vcmp.eq.f32.partialorder %v376_v9, 0.0  ;;  %v411_v33 = vld [vmem:[%s1306_s14] sm:$0xf]  ;;  %p1002_p12 = scmp.ne.s32.totalorder %s1326_s22, %s1001_s12  ;;  %s1005_s10 = sshll.u32 %s1122_s28, 4  ;;  %s1006_s10 = int_to_ptr.vmem [resolvable:$false] %s1005_s10 }
  0x5a   : > { %v488_v34 = vld [vmem:[%s348_s17] sm:$0xf]  ;;  %s1007_s24 = scalar_lea.vmem %s1006_s10, 128  ;;  %p1008_p3 = scmp.lt.s32.totalorder %s1326_s22, %s1006_s10 }
  0x5b   : > { %p1003_p0 = pnand %p1002_p12, %p1209_p9  ;;  %p1009_p2 = scmp.lt.s32.totalorder %s1007_s24, %s1001_s12 }
  0x5d   : > { %p1004_p1 = pneg %p1003_p0  ;;  %p1010_p4 = por %p1009_p2, %p1008_p3 }
  0x5f   : > { %v564_v30 = vld [vmem:[%s361_s27] sm:$0xff]  ;;  %p1011_p5 = pnand %p1010_p4, %p1004_p1 }
  0x66   : > { %v916_v10 = vpop.eup %915 }
  0x67   : > { %v378_v12 = vmul.f32 %v916_v10, %v376_v9 }
  0x69   : > { %v380_v13 = vsel %vm379_vm1, %v376_v9, %v378_v12 }
  0x6a   : > { %v383_v14 = vsel %vm381_vm2, %v382_v11, %v380_v13 }
  0x6b   : > { %v384_v15 = vmul.f32 0.5, %v383_v14 }
  0x6d   : > { %v385_v17 = vadd.f32 -0.5, %v384_v15 }
  0x6f   : > { %vm386_vm3 = vcmp.lt.f32.partialorder %v385_v17, 0.0  ;;  %vm387_vm4 = vcmp.gt.f32.partialorder %v385_v17, 8.0  ;;  %vm389_vm5 = vweird.f32 %v385_v17 }
  0x70   : > { %vm388_vm6 = vmor %vm386_vm3, %vm387_vm4 }
  0x71   : > { %vm390_vm7 = vmor %vm388_vm6, %vm389_vm5 }
  0x72   : > { %v391_v19 = vsel %vm390_vm7, 8.0, %v385_v17 }
  0x73   : > { %v832_v20 = vtrunc.f32 %v391_v19 }
  0x75   : > { %v833_v23 = vcvt.f32.s32 %v832_v20 }
  0x77   : > { %v404_v24 = vrot.slane %v833_v23, %v403_v21  ;;  %v400_v25 = vrot.slane %v833_v23, %v399_v22 }
  0x79   : > { %vm406_vm8 = vcmp.eq.s32.totalorder %v404_v24, %v396_v18  ;;  %vm405_vm9 = vcmp.eq.s32.totalorder %v400_v25, %v396_v18 }
  0x7a   : > { %819 = vmatprep.subr.msk.mxu0 %vm406_vm8, %v1121_v26  ;;  %821 = vmatprep.subr.msk.mxu1 %vm406_vm8, %v1121_v26  ;;  %v817_v27 = vsel %vm405_vm9, 1.0, %v1120_v0  ;;  %v818_v28 = vsel %vm406_vm8, 1.0, %v1120_v0 }
  0x7b   : > { %820 = vmatpush1.xpose.msk.msra.mxu0 %vm405_vm9, %v1121_v26  ;;  %822 = vmatpush1.xpose.msk.msra.mxu1 %vm405_vm9, %v1121_v26  ;;  %v565_v29 = vadd.f32 %v818_v28, %v817_v27 }
  0x7d   : > { %566 = vadd.xlane.f32.xlu0 %v565_v29 }
  0x7e   : > { %480 = vmatmul.mubr.f32.vlgmr.msra.gmra.mxu0 %v393_v2  ;;  %557 = vmatmul.mubr.f32.vlgmr.msra.gmra.mxu1 %v394_v3 }
 0x106   : > { %v567_v31 = vpop.xlane.xlu0 %566 }
 0x107   : > { %v568_v32 = vadd.f32 %v567_v31, %v564_v30 }
 0x109   : > { %570 = vst.msk [vmem:[%s361_s27] sm:$0xff] %vm369_vm10, %v568_v32 }
 0x13e   : > { %v481_v35 = vpop.f32.mrf.mxu0  ;;  %v558_v36 = vpop.f32.mrf.mxu1 }
 0x13f   : > { %v485_v37 = vadd.f32 %v481_v35, %v411_v33  ;;  %v562_v38 = vadd.f32 %v558_v36, %v488_v34 }
 0x140   : > { %v483_v39 = vpop.f32.mrf.mxu0  ;;  %v560_v40 = vpop.f32.mrf.mxu1 }
 0x141   : > { %487 = vst.msk [vmem:[%s1306_s14] sm:$0xf] %vm366_vm0, %v485_v37  ;;  %563 = vst.msk [vmem:[%s348_s17] sm:$0xf] %vm366_vm0, %v562_v38 }
 0x142   : > { %1014 = shalt.err (!%p1011_p5)
}
 0x143   : > { %s1015_s14 = scalar_lea.hbm %s1324_s13, 64  ;;  %s1019_s17 = scalar_lea.hbm %s1406_s3, 128 }
 0x144   : > { %p1016_p7 = scmp.ne.s32.totalorder %s1324_s13, %s1015_s14  ;;  %p1020_p13 = scmp.lt.s32.totalorder %s1324_s13, %s1406_s3 }
 0x145   : > { %p1021_p8 = scmp.lt.s32.totalorder %s1019_s17, %s1015_s14 }
 0x146   : > { %p1017_p6 = pnand %p1016_p7, %p1209_p9 }
 0x147   : > { %p1022_p12 = por %p1021_p8, %p1020_p13 }
 0x148   : > { %p1018_p10 = pneg %p1017_p6 }
 0x14a   : > { %p1023_p0 = pnand %p1022_p12, %p1018_p10 }
 0x14c   : > { %1026 = shalt.err (!%p1023_p0)
}
 0x14d   : > { %840 = dma.vmem_to_hbm [thread:$0]  (%p1209_p9), %s1326_s22, 64, %s1324_s13, %s572_s26  }
 0x14e   : > { %s577_s27 = scalar_lea.sflag [#allocation10], %s1289_s11  ;;  %s1027_s1 = scalar_lea.vmem %s1333_s9, 64 }
 0x14f   : > { %p1028_p1 = scmp.ne.s32.totalorder %s1333_s9, %s1027_s1  ;;  %s1123_s20 = smov [#allocation9]  }
 0x150   : > { %s1031_s7 = sshll.u32 %s1123_s20, 4  ;;  %s1032_s7 = int_to_ptr.vmem [resolvable:$false] %s1031_s7 }
 0x151   : > { %p1029_p3 = pnand %p1028_p1, %p1209_p9  ;;  %s1033_s21 = scalar_lea.vmem %s1032_s7, 128 }
 0x152   : > { %p1034_p4 = scmp.lt.s32.totalorder %s1333_s9, %s1032_s7  ;;  %p1035_p5 = scmp.lt.s32.totalorder %s1033_s21, %s1027_s1 }
 0x153   : > { %p1030_p2 = pneg %p1029_p3 }
 0x154   : > { %p1036_p7 = por %p1035_p5, %p1034_p4 }
 0x156   : > { %p1037_p6 = pnand %p1036_p7, %p1030_p2 }
 0x158   : > { %1040 = shalt.err (!%p1037_p6)
}
 0x159   : > { %s1041_s22 = scalar_lea.hbm %s1331_s2, 64  ;;  %s1045_s29 = scalar_lea.hbm %s1407_s4, 128 }
 0x15a   : > { %p1042_p10 = scmp.ne.s32.totalorder %s1331_s2, %s1041_s22  ;;  %p1046_p12 = scmp.lt.s32.totalorder %s1331_s2, %s1407_s4 }
 0x15b   : > { %p1047_p0 = scmp.lt.s32.totalorder %s1045_s29, %s1041_s22 }
 0x15c   : > { %p1043_p13 = pnand %p1042_p10, %p1209_p9 }
 0x15d   : > { %p1048_p1 = por %p1047_p0, %p1046_p12 }
 0x15e   : > { %p1044_p8 = pneg %p1043_p13 }
 0x160   : > { %p1049_p3 = pnand %p1048_p1, %p1044_p8 }
 0x162   : > { %1052 = shalt.err (!%p1049_p3)
}
 0x163   : > { %841 = dma.vmem_to_hbm [thread:$0]  (%p1209_p9), %s1333_s9, 64, %s1331_s2, %s577_s27  }
 0x164 PF: > { %s622_s28 = sand.u32 1, %s1095_s18   ;;  %p1426_p2 = scmp.ge.s32.totalorder %s1115_s23, 2 }
 0x165   : > { %s623_s10 = scalar_lea.sflag [#allocation4], %s622_s28 }
 0x166   : > { %p855_p4 = pnand %p1426_p2, %p1216_p11 }
 0x168   : > { %p856_p5 = pneg %p855_p4 }
 0x16a   : > { %1086 = dma.done.wait (%p856_p5), %s623_s10, 64  }
 0x16b   : > { %1088 = vsyncadd (%p856_p5), %s623_s10, 4294967232  ;;  %s632_s24 = scalar_lea.sflag [#allocation10], %s622_s28 }
 0x16c   : > { %1090 = dma.done.wait (%p856_p5), %s632_s24, 64  }
 0x16d   : > { %1092 = vsyncadd (%p856_p5), %s632_s24, 4294967232  ;;  %s28_s23 = sadd.s32 1, %s1115_s23   ;;  %s1427_s6 = sld [smem:[#allocation15_spill]] }
 0x16e   : > { %p25_p7 = scmp.ge.s32.totalorder %s28_s23, 4   ;;  %s1428_s20 = sld [smem:[#allocation18_spill]] }
 0x16f   : > { %s1429_s21 = sld [smem:[#allocation16_spill]]  ;;  %s1431_s18 = smov %s1099_s19 }
 0x170   : > { %s1430_s22 = sld [smem:[#allocation17_spill]]  ;;  %27 = sbr.rel (!%p25_p7) target bundleno = 13 (0xd), region = 134 }
 0x173   : > { %s1432_s19 = smov %s1427_s6 }
 0x175   :  { %644 = vsyncpa [#allocation3], 1 }
 0x176   :  { %646 = vsyncpa [#allocation3 + $0x1], 1 }
 0x177   :  { %647 = vsyncpa [#allocation6], 1 }
 0x178   :  { %649 = vsyncpa [#allocation6 + $0x1], 1 }
 0x179   :  { %650 = vsyncpa [#allocation4], 1 }
 0x17a   :  { %652 = vsyncpa [#allocation4 + $0x1], 1 }
 0x17b   :  { %653 = vsyncpa [#allocation10], 1 }
 0x17c   :  { %655 = vsyncpa [#allocation10 + $0x1], 1 }

</bundles_post_ra>
